<compile_context>
chip_gen: v7x
topology: tpu7x:2x2x1
jax: 0.10.0
libtpu: 0.0.40
codegen_flags: <defaults>
</compile_context>

<pallas_src>
import functools
import math

import jax
import jax.numpy as jnp
from jax.experimental import pallas as pl
from jax.experimental.pallas import tpu as pltpu

HIDDEN = 128   # fixed by the module definition (l1..l3 output width)
LANE = 128     # TPU lane width


def _round_up(n, m):
    return ((n + m - 1) // m) * m


def mlp_kernel(x_ref,
               w1_ref, b1_ref,
               w2_ref, b2_ref,
               w3_ref, b3_ref,
               w4_ref, b4_ref,
               o_ref):
    """Fused 4-layer MLP forward on one (TM, in_features) batch tile.

    bf16 matmul operands (MXU fast path), f32 accumulate / bias / ReLU.
    """
    f32 = jnp.float32
    bf16 = jnp.bfloat16

    x = x_ref[...]                                                    # bf16

    h = jnp.dot(x, w1_ref[...], preferred_element_type=f32) + b1_ref[...]
    h = jnp.maximum(h, 0.0)

    h = jnp.dot(h.astype(bf16), w2_ref[...], preferred_element_type=f32) + b2_ref[...]
    h = jnp.maximum(h, 0.0)

    h = jnp.dot(h.astype(bf16), w3_ref[...], preferred_element_type=f32) + b3_ref[...]
    h = jnp.maximum(h, 0.0)

    out = jnp.dot(h.astype(bf16), w4_ref[...], preferred_element_type=f32) + b4_ref[...]
    o_ref[...] = out.astype(o_ref.dtype)


@functools.partial(jax.jit, static_argnames=("tm",))
def neural_net_forward(x, params, *, tm=512):
    """Forward pass of NeuralNet via a single batch-gridded Pallas kernel.

    x: (B, input_size) float32
    params: dict with w1..w4 stored (in, out) f32 and b1..b4 stored (1, out) f32
            (i.e. the transpose of PyTorch's nn.Linear (out, in) weight layout).
    tm: target batch tile (large tiles amortize per-step overhead; clamped for
        tiny batches).
    """
    B, in_features = x.shape
    num_classes = params["w4"].shape[1]

    n_out = _round_up(num_classes, LANE)        # lane-dense output slab
    TM = min(tm, _round_up(B, 8))               # batch tile, multiple of 8
    Bp = _round_up(B, TM)                       # padded batch

    # --- operand preparation (bf16 matmul operands, f32 biases) -------------
    xb = x.astype(jnp.bfloat16)
    if Bp != B:
        xb = jnp.pad(xb, ((0, Bp - B), (0, 0)))

    w1 = params["w1"].astype(jnp.bfloat16)
    w2 = params["w2"].astype(jnp.bfloat16)
    w3 = params["w3"].astype(jnp.bfloat16)
    w4 = jnp.zeros((HIDDEN, n_out), jnp.bfloat16).at[:, :num_classes].set(
        params["w4"].astype(jnp.bfloat16))

    b1 = params["b1"].reshape(1, -1).astype(jnp.float32)
    b2 = params["b2"].reshape(1, -1).astype(jnp.float32)
    b3 = params["b3"].reshape(1, -1).astype(jnp.float32)
    b4 = jnp.zeros((1, n_out), jnp.float32).at[:, :num_classes].set(
        params["b4"].reshape(1, -1).astype(jnp.float32))

    # --- block specs ---------------------------------------------------------
    def batch_tile(shape):
        return pl.BlockSpec(shape, lambda i: (i, 0))

    def resident(shape):
        # Constant index_map: fetched once, stays in VMEM across grid steps.
        return pl.BlockSpec(shape, lambda i: (0, 0))

    in_specs = [
        batch_tile((TM, in_features)),
        resident(w1.shape), resident(b1.shape),
        resident(w2.shape), resident(b2.shape),
        resident(w3.shape), resident(b3.shape),
        resident(w4.shape), resident(b4.shape),
    ]
    out_specs = batch_tile((TM, n_out))

    out_padded = pl.pallas_call(
        mlp_kernel,
        out_shape=jax.ShapeDtypeStruct((Bp, n_out), jnp.float32),
        grid_spec=pltpu.PrefetchScalarGridSpec(
            num_scalar_prefetch=0,
            grid=(Bp // TM,),
            in_specs=in_specs,
            out_specs=out_specs,
        ),
        compiler_params=pltpu.CompilerParams(
            dimension_semantics=("parallel",),   # megacore sharding on v7x
        ),
    )(xb, w1, b1, w2, b2, w3, b3, w4, b4)

    return out_padded[:B, :num_classes]


def init_params(key, input_size, hidden_size, num_classes):
    """Deterministic init mimicking PyTorch nn.Linear default
    (uniform in [-1/sqrt(fan_in), 1/sqrt(fan_in)]).  Weights stored (in, out)."""
    del hidden_size  # the module hard-codes 128
    dims = [(input_size, 128), (128, 128), (128, 128), (128, num_classes)]
    params = {}
    for i, (fan_in, fan_out) in enumerate(dims, start=1):
        key, kw, kb = jax.random.split(key, 3)
        bound = 1.0 / math.sqrt(fan_in)
        params[f"w{i}"] = jax.random.uniform(
            kw, (fan_in, fan_out), jnp.float32, minval=-bound, maxval=bound)
        params[f"b{i}"] = jax.random.uniform(
            kb, (1, fan_out), jnp.float32, minval=-bound, maxval=bound)
    return params


def reference_forward(x, params):
    """Plain-JAX reference using the same bf16-operand / f32-accumulate math."""
    bf16, f32 = jnp.bfloat16, jnp.float32

    def lin(h, w, b):
        return jnp.dot(h.astype(bf16), w.astype(bf16),
                       preferred_element_type=f32) + b.astype(f32)

    h = jnp.maximum(lin(x, params["w1"], params["b1"]), 0.0)
    h = jnp.maximum(lin(h, params["w2"], params["b2"]), 0.0)
    h = jnp.maximum(lin(h, params["w3"], params["b3"]), 0.0)
    return lin(h, params["w4"], params["b4"])


if __name__ == "__main__":
    key = jax.random.PRNGKey(0)

    input_size = 32
    hidden_size = 128
    num_classes = 10

    key, kx1, kx2, kp = jax.random.split(key, 4)
    params = init_params(kp, input_size, hidden_size, num_classes)

    # Case 1: tiny batch (single grid step, TM clamped to 8).
    x1 = jax.random.normal(kx1, (8, input_size), jnp.float32)
    out1 = jax.block_until_ready(neural_net_forward(x1, params))
    ref1 = reference_forward(x1, params)
    assert out1.shape == (8, num_classes)
    assert jnp.allclose(out1, ref1, atol=1e-3, rtol=1e-3), "mismatch (case 1)"

    # Case 2: ragged batch exercising the grid + batch padding (40 -> 48, 3 steps).
    x2 = jax.random.normal(kx2, (40, input_size), jnp.float32)
    out2 = jax.block_until_ready(neural_net_forward(x2, params, tm=16))
    ref2 = reference_forward(x2, params)
    assert out2.shape == (40, num_classes)
    assert jnp.allclose(out2, ref2, atol=1e-3, rtol=1e-3), "mismatch (case 2)"

    print("KERNEL_OK")
</pallas_src>

<mosaic_0001>
module attributes {stable_mosaic.version = 11 : i64} {
  func.func @mlp_kernel(%arg0: i32, %arg1: memref<8x32xbf16, #tpu.memory_space<vmem>>, %arg2: memref<32x128xbf16, #tpu.memory_space<vmem>>, %arg3: memref<1x128xf32, #tpu.memory_space<vmem>>, %arg4: memref<128x128xbf16, #tpu.memory_space<vmem>>, %arg5: memref<1x128xf32, #tpu.memory_space<vmem>>, %arg6: memref<128x128xbf16, #tpu.memory_space<vmem>>, %arg7: memref<1x128xf32, #tpu.memory_space<vmem>>, %arg8: memref<128x128xbf16, #tpu.memory_space<vmem>>, %arg9: memref<1x128xf32, #tpu.memory_space<vmem>>, %arg10: memref<8x128xf32, #tpu.memory_space<vmem>>) attributes {dimension_semantics = [#tpu.dimension_semantics<parallel>], iteration_bounds = array<i64: 1>, scalar_prefetch = 0 : i64, scratch_operands = 0 : i64, tpu.core_type = #tpu.core_type<tc>, window_params = [{transform_indices = @transform_0, window_bounds = array<i64: 8, 32>}, {pipeline_mode = #tpu.pipeline_mode<synchronous>, transform_indices = @transform_1, window_bounds = array<i64: 32, 128>}, {pipeline_mode = #tpu.pipeline_mode<synchronous>, transform_indices = @transform_2, window_bounds = array<i64: 1, 128>}, {pipeline_mode = #tpu.pipeline_mode<synchronous>, transform_indices = @transform_3, window_bounds = array<i64: 128, 128>}, {pipeline_mode = #tpu.pipeline_mode<synchronous>, transform_indices = @transform_4, window_bounds = array<i64: 1, 128>}, {pipeline_mode = #tpu.pipeline_mode<synchronous>, transform_indices = @transform_5, window_bounds = array<i64: 128, 128>}, {pipeline_mode = #tpu.pipeline_mode<synchronous>, transform_indices = @transform_6, window_bounds = array<i64: 1, 128>}, {pipeline_mode = #tpu.pipeline_mode<synchronous>, transform_indices = @transform_7, window_bounds = array<i64: 128, 128>}, {pipeline_mode = #tpu.pipeline_mode<synchronous>, transform_indices = @transform_8, window_bounds = array<i64: 1, 128>}, {transform_indices = @transform_9, window_bounds = array<i64: 8, 128>}]} {
    %c0 = arith.constant 0 : index
    %c0_0 = arith.constant 0 : index
    %0 = vector.load %arg1[%c0, %c0_0] : memref<8x32xbf16, #tpu.memory_space<vmem>>, vector<8x32xbf16>
    %c0_1 = arith.constant 0 : index
    %c0_2 = arith.constant 0 : index
    %1 = vector.load %arg2[%c0_1, %c0_2] : memref<32x128xbf16, #tpu.memory_space<vmem>>, vector<32x128xbf16>
    %cst = arith.constant dense<0.000000e+00> : vector<8x128xf32>
    %2 = tpu.matmul %0, %1, %cst {dimension_numbers = #tpu.dot_dimension_numbers<[1], [0], [0], [1], [0, 0, 1, 1], [], []>} : vector<8x32xbf16>, vector<32x128xbf16>, vector<8x128xf32> -> vector<8x128xf32>
    %c0_3 = arith.constant 0 : index
    %c0_4 = arith.constant 0 : index
    %3 = vector.load %arg3[%c0_3, %c0_4] : memref<1x128xf32, #tpu.memory_space<vmem>>, vector<1x128xf32>
    %4 = vector.broadcast %3 : vector<1x128xf32> to vector<8x128xf32>
    %5 = arith.addf %2, %4 : vector<8x128xf32>
    %cst_5 = arith.constant 0.000000e+00 : f32
    %6 = vector.broadcast %cst_5 : f32 to vector<8x128xf32>
    %7 = arith.maximumf %5, %6 : vector<8x128xf32>
    %8 = arith.truncf %7 : vector<8x128xf32> to vector<8x128xbf16>
    %c0_6 = arith.constant 0 : index
    %c0_7 = arith.constant 0 : index
    %9 = vector.load %arg4[%c0_6, %c0_7] : memref<128x128xbf16, #tpu.memory_space<vmem>>, vector<128x128xbf16>
    %cst_8 = arith.constant dense<0.000000e+00> : vector<8x128xf32>
    %10 = tpu.matmul %8, %9, %cst_8 {dimension_numbers = #tpu.dot_dimension_numbers<[1], [0], [0], [1], [0, 0, 1, 1], [], []>} : vector<8x128xbf16>, vector<128x128xbf16>, vector<8x128xf32> -> vector<8x128xf32>
    %c0_9 = arith.constant 0 : index
    %c0_10 = arith.constant 0 : index
    %11 = vector.load %arg5[%c0_9, %c0_10] : memref<1x128xf32, #tpu.memory_space<vmem>>, vector<1x128xf32>
    %12 = vector.broadcast %11 : vector<1x128xf32> to vector<8x128xf32>
    %13 = arith.addf %10, %12 : vector<8x128xf32>
    %cst_11 = arith.constant 0.000000e+00 : f32
    %14 = vector.broadcast %cst_11 : f32 to vector<8x128xf32>
    %15 = arith.maximumf %13, %14 : vector<8x128xf32>
    %16 = arith.truncf %15 : vector<8x128xf32> to vector<8x128xbf16>
    %c0_12 = arith.constant 0 : index
    %c0_13 = arith.constant 0 : index
    %17 = vector.load %arg6[%c0_12, %c0_13] : memref<128x128xbf16, #tpu.memory_space<vmem>>, vector<128x128xbf16>
    %cst_14 = arith.constant dense<0.000000e+00> : vector<8x128xf32>
    %18 = tpu.matmul %16, %17, %cst_14 {dimension_numbers = #tpu.dot_dimension_numbers<[1], [0], [0], [1], [0, 0, 1, 1], [], []>} : vector<8x128xbf16>, vector<128x128xbf16>, vector<8x128xf32> -> vector<8x128xf32>
    %c0_15 = arith.constant 0 : index
    %c0_16 = arith.constant 0 : index
    %19 = vector.load %arg7[%c0_15, %c0_16] : memref<1x128xf32, #tpu.memory_space<vmem>>, vector<1x128xf32>
    %20 = vector.broadcast %19 : vector<1x128xf32> to vector<8x128xf32>
    %21 = arith.addf %18, %20 : vector<8x128xf32>
    %cst_17 = arith.constant 0.000000e+00 : f32
    %22 = vector.broadcast %cst_17 : f32 to vector<8x128xf32>
    %23 = arith.maximumf %21, %22 : vector<8x128xf32>
    %24 = arith.truncf %23 : vector<8x128xf32> to vector<8x128xbf16>
    %c0_18 = arith.constant 0 : index
    %c0_19 = arith.constant 0 : index
    %25 = vector.load %arg8[%c0_18, %c0_19] : memref<128x128xbf16, #tpu.memory_space<vmem>>, vector<128x128xbf16>
    %cst_20 = arith.constant dense<0.000000e+00> : vector<8x128xf32>
    %26 = tpu.matmul %24, %25, %cst_20 {dimension_numbers = #tpu.dot_dimension_numbers<[1], [0], [0], [1], [0, 0, 1, 1], [], []>} : vector<8x128xbf16>, vector<128x128xbf16>, vector<8x128xf32> -> vector<8x128xf32>
    %c0_21 = arith.constant 0 : index
    %c0_22 = arith.constant 0 : index
    %27 = vector.load %arg9[%c0_21, %c0_22] : memref<1x128xf32, #tpu.memory_space<vmem>>, vector<1x128xf32>
    %28 = vector.broadcast %27 : vector<1x128xf32> to vector<8x128xf32>
    %29 = arith.addf %26, %28 : vector<8x128xf32>
    %c0_23 = arith.constant 0 : index
    %c0_24 = arith.constant 0 : index
    %30 = vector.load %arg10[%c0_23, %c0_24] : memref<8x128xf32, #tpu.memory_space<vmem>>, vector<8x128xf32>
    tpu.vector_store %arg10[%c0_23, %c0_24], %29 {strides = array<i32>} : memref<8x128xf32, #tpu.memory_space<vmem>>, vector<8x128xf32>,
    return
  }
  func.func @transform_0(%arg0: i32) -> (i32, i32) {
    %c0_i32 = arith.constant 0 : i32
    %c0_i32_0 = arith.constant 0 : i32
    return %arg0, %c0_i32 : i32, i32
  }
  func.func @transform_1(%arg0: i32) -> (i32, i32) {
    %c0_i32 = arith.constant 0 : i32
    %c0_i32_0 = arith.constant 0 : i32
    %c0_i32_1 = arith.constant 0 : i32
    return %c0_i32, %c0_i32_0 : i32, i32
  }
  func.func @transform_2(%arg0: i32) -> (i32, i32) {
    %c0_i32 = arith.constant 0 : i32
    %c0_i32_0 = arith.constant 0 : i32
    %c0_i32_1 = arith.constant 0 : i32
    return %c0_i32, %c0_i32_0 : i32, i32
  }
  func.func @transform_3(%arg0: i32) -> (i32, i32) {
    %c0_i32 = arith.constant 0 : i32
    %c0_i32_0 = arith.constant 0 : i32
    %c0_i32_1 = arith.constant 0 : i32
    return %c0_i32, %c0_i32_0 : i32, i32
  }
  func.func @transform_4(%arg0: i32) -> (i32, i32) {
    %c0_i32 = arith.constant 0 : i32
    %c0_i32_0 = arith.constant 0 : i32
    %c0_i32_1 = arith.constant 0 : i32
    return %c0_i32, %c0_i32_0 : i32, i32
  }
  func.func @transform_5(%arg0: i32) -> (i32, i32) {
    %c0_i32 = arith.constant 0 : i32
    %c0_i32_0 = arith.constant 0 : i32
    %c0_i32_1 = arith.constant 0 : i32
    return %c0_i32, %c0_i32_0 : i32, i32
  }
  func.func @transform_6(%arg0: i32) -> (i32, i32) {
    %c0_i32 = arith.constant 0 : i32
    %c0_i32_0 = arith.constant 0 : i32
    %c0_i32_1 = arith.constant 0 : i32
    return %c0_i32, %c0_i32_0 : i32, i32
  }
  func.func @transform_7(%arg0: i32) -> (i32, i32) {
    %c0_i32 = arith.constant 0 : i32
    %c0_i32_0 = arith.constant 0 : i32
    %c0_i32_1 = arith.constant 0 : i32
    return %c0_i32, %c0_i32_0 : i32, i32
  }
  func.func @transform_8(%arg0: i32) -> (i32, i32) {
    %c0_i32 = arith.constant 0 : i32
    %c0_i32_0 = arith.constant 0 : i32
    %c0_i32_1 = arith.constant 0 : i32
    return %c0_i32, %c0_i32_0 : i32, i32
  }
  func.func @transform_9(%arg0: i32) -> (i32, i32) {
    %c0_i32 = arith.constant 0 : i32
    %c0_i32_0 = arith.constant 0 : i32
    return %arg0, %c0_i32 : i32, i32
  }
}

</mosaic_0001>

<bundles_post_ra>
// kernel: neural_net_forward.1
= control target key start
LH: loop header
LB: loop body
LE: loop exit
PB: predicated region body
PF: predicated region fallthrough
CT: control target
= control target key end

     0   :  { %v638_v1 = vmov 0.0   ;;  %vm639_vm0 = vmmov 0   ;;  %vm58_vm1 = vcmask 261120   ;;  %s830_s0 = inlined_call_operand.vmem [shape: bf16[8,32], index: 0, kind: input, shape index: {}]   ;;  %s831_s1 = inlined_call_operand.vmem [shape: bf16[32,128], index: 1, kind: input, shape index: {}]   ;;  %s832_s2 = inlined_call_operand.vmem [shape: f32[1,128], index: 2, kind: input, shape index: {}]   ;;  %s833_s3 = inlined_call_operand.vmem [shape: bf16[128,128], index: 3, kind: input, shape index: {}]   ;;  %s834_s4 = inlined_call_operand.vmem [shape: f32[1,128], index: 4, kind: input, shape index: {}]   ;;  %s835_s5 = inlined_call_operand.vmem [shape: bf16[128,128], index: 5, kind: input, shape index: {}]   ;;  %s836_s6 = inlined_call_operand.vmem [shape: f32[1,128], index: 6, kind: input, shape index: {}]   ;;  %s837_s7 = inlined_call_operand.vmem [shape: bf16[128,128], index: 7, kind: input, shape index: {}]   ;;  %s838_s8 = inlined_call_operand.vmem [shape: f32[1,128], index: 8, kind: input, shape index: {}]   ;;  %s839_s9 = inlined_call_operand.hbm [shape: f32[8,128], index: 9, kind: output, shape index: {}]  }
   0x1   :  { %v588_v0 = vld [vmem:[%s831_s1] sm:$0xff]   ;;  %517 = vmatprep.subr.bf16.mxu0 %v638_v1  ;;  %525 = vmatprep.subr.bf16.mxu1 %v638_v1  ;;  %v589_v2 = vld [vmem:[%s831_s1 + $0x8] sm:$0xff]   ;;  %v592_v6 = vld [vmem:[%s833_s3 + $0x10] sm:$0xff]  }
   0x2   :  { %518 = vmatpush3.bf16.msra.mxu0 %v588_v0  ;;  %521 = vmatprep.mubr.msk.bf16.mxu0 %vm639_vm0, %v638_v1  ;;  %v590_v3 = vld [vmem:[%s833_s3] sm:$0xff]   ;;  %v591_v4 = vld [vmem:[%s833_s3 + $0x8] sm:$0xff]   ;;  %v593_v7 = vld [vmem:[%s833_s3 + $0x18] sm:$0xff]  }
   0x3   :  { %519 = vmatprep.subr.bf16.mxu0 %v638_v1  ;;  %541 = vmatprep.mubr.msk.bf16.mxu1 %vm639_vm0, %v638_v1  ;;  %v34_v5 = vld [vmem:[%s830_s0] sm:$0xf]  ;;  %v595_v9 = vld [vmem:[%s833_s3 + $0x28] sm:$0xff]  }
   0x4   :  { %526 = vmatpush3.bf16.msra.mxu1 %v590_v3  ;;  %v594_v8 = vld [vmem:[%s833_s3 + $0x20] sm:$0xff]  }
   0x5   :  { %527 = vmatprep.subr.bf16.mxu1 %v638_v1 }
   0x6   :  { %520 = vmatpush3.bf16.msra.mxu0 %v589_v2 }
   0x7   :  { %545 = vmatprep.subr.bf16.mxu0 %v638_v1 }
   0x8   :  { %528 = vmatpush3.bf16.msra.mxu1 %v591_v4 }
   0x9   :  { %522 = vmatmul.mubr.msk.bf16.vlgmr.msra.gmra.mrb[0].mxu0 %vm58_vm1, %v34_v5  ;;  %529 = vmatprep.subr.bf16.mxu1 %v638_v1 }
   0xa   :  { %561 = vmatprep.mubr.msk.bf16.mxu0 %vm639_vm0, %v638_v1 }
   0xc   :  { %530 = vmatpush3.bf16.msra.mxu1 %v592_v6 }
   0xd   :  { %531 = vmatprep.subr.bf16.mxu1 %v638_v1 }
  0x10   :  { %532 = vmatpush3.bf16.msra.mxu1 %v593_v7 }
  0x11   :  { %533 = vmatprep.subr.bf16.mxu1 %v638_v1 }
  0x14   :  { %534 = vmatpush3.bf16.msra.mxu1 %v594_v8 }
  0x15   :  { %14 = vsyncpa [#allocation3], 0  ;;  %535 = vmatprep.subr.bf16.mxu1 %v638_v1  ;;  %v596_v10 = vld [vmem:[%s833_s3 + $0x30] sm:$0xff]   ;;  %v597_v11 = vld [vmem:[%s833_s3 + $0x38] sm:$0xff]   ;;  %s640_s19 = smov [#allocation2]  }
  0x16   :  { %v598_v12 = vld [vmem:[%s835_s5] sm:$0xff]   ;;  %v599_v13 = vld [vmem:[%s835_s5 + $0x8] sm:$0xff]   ;;  %v600_v14 = vld [vmem:[%s835_s5 + $0x10] sm:$0xff]   ;;  %s448_s20 = sshll.u32 %s640_s19, 4  ;;  %s449_s20 = int_to_ptr.vmem [resolvable:$true] %s448_s20 }
  0x17   :  { %546 = vmatpush3.bf16.msra.mxu0 %v598_v12  ;;  %v601_v15 = vld [vmem:[%s835_s5 + $0x18] sm:$0xff]   ;;  %v602_v16 = vld [vmem:[%s835_s5 + $0x20] sm:$0xff]   ;;  %v603_v17 = vld [vmem:[%s835_s5 + $0x28] sm:$0xff]   ;;  %p619_p1 = scmp.lt.s32.totalorder %s449_s20, %s449_s20 }
  0x18   :  { %536 = vmatpush3.bf16.msra.mxu1 %v595_v9  ;;  %547 = vmatprep.subr.bf16.mxu0 %v638_v1  ;;  %v456_v18 = vld [vmem:[%s832_s2] ss:$0 sm:$0xff]  ;;  %v604_v26 = vld [vmem:[%s835_s5 + $0x30] sm:$0xff]   ;;  %v605_v27 = vld [vmem:[%s835_s5 + $0x38] sm:$0xff]  }
  0x19   :  { %537 = vmatprep.subr.bf16.mxu1 %v638_v1  ;;  %v606_v28 = vld [vmem:[%s837_s7] sm:$0xff]   ;;  %v607_v29 = vld [vmem:[%s837_s7 + $0x8] sm:$0xff]   ;;  %v608_v30 = vld [vmem:[%s837_s7 + $0x10] sm:$0xff]  }
  0x1a   :  { %v609_v31 = vld [vmem:[%s837_s7 + $0x18] sm:$0xff]   ;;  %v610_v32 = vld [vmem:[%s837_s7 + $0x20] sm:$0xff]   ;;  %v611_v33 = vld [vmem:[%s837_s7 + $0x28] sm:$0xff]  }
  0x1b   :  { %548 = vmatpush3.bf16.msra.mxu0 %v599_v13  ;;  %v460_v34 = vld [vmem:[%s834_s4] ss:$0 sm:$0xff]  ;;  %v612_v42 = vld [vmem:[%s837_s7 + $0x30] sm:$0xff]   ;;  %v613_v43 = vld [vmem:[%s837_s7 + $0x38] sm:$0xff]  }
  0x1c   :  { %538 = vmatpush3.bf16.msra.mxu1 %v596_v10  ;;  %549 = vmatprep.subr.bf16.mxu0 %v638_v1  ;;  %v469_v44 = vld [vmem:[%s836_s6] ss:$0 sm:$0xff]  ;;  %s614_s6 = scalar_lea.vmem %s449_s20, 128 }
  0x1d   :  { %539 = vmatprep.subr.bf16.mxu1 %v638_v1  ;;  %v478_v52 = vld [vmem:[%s838_s8] ss:$0 sm:$0xff]  ;;  %p615_p0 = scmp.ne.s32.totalorder %s449_s20, %s614_s6  ;;  %p620_p2 = scmp.lt.s32.totalorder %s614_s6, %s614_s6 }
  0x1f   :  { %550 = vmatpush3.bf16.msra.mxu0 %v600_v14  ;;  %p621_p3 = por %p620_p2, %p619_p1 }
  0x20   :  { %540 = vmatpush3.bf16.msra.mxu1 %v597_v11  ;;  %551 = vmatprep.subr.bf16.mxu0 %v638_v1 }
  0x21   :  { %565 = vmatprep.subr.bf16.mxu1 %v638_v1  ;;  %p622_p4 = pnand %p621_p3, %p615_p0 }
  0x23   :  { %552 = vmatpush3.bf16.msra.mxu0 %v601_v15 }
  0x24   :  { %553 = vmatprep.subr.bf16.mxu0 %v638_v1 }
  0x27   :  { %554 = vmatpush3.bf16.msra.mxu0 %v602_v16 }
  0x28   :  { %555 = vmatprep.subr.bf16.mxu0 %v638_v1 }
  0x2b   :  { %556 = vmatpush3.bf16.msra.mxu0 %v603_v17 }
  0x2c   :  { %557 = vmatprep.subr.bf16.mxu0 %v638_v1 }
  0x2f   :  { %558 = vmatpush3.bf16.msra.mxu0 %v604_v26 }
  0x30   :  { %559 = vmatprep.subr.bf16.mxu0 %v638_v1 }
  0x33   :  { %560 = vmatpush3.bf16.msra.mxu0 %v605_v27 }
  0xdc   :  { %v96_v19 = vpop.f32.mrb[0].mxu0 }
  0xdd   :  { %v97_v20 = vadd.f32 %v456_v18, %v96_v19  ;;  %v523_v21 = vpop.f32.mrb[1].mxu0 }
  0xde   :  { %v99_v22 = vpop.f32.mrb[2].mxu0 }
  0xdf   :  { %v102_v23 = vmax.f32 %v97_v20, 0.0  ;;  %v524_v24 = vpop.f32.mrb[3].mxu0 }
  0xe1   :  { %v103_v25 = vpack.c.bf16 %v102_v23, %v102_v23 }
  0xe3   :  { %542 = vmatmul.mubr.bf16.vlgmr.msra.gmra.mrb[0].mxu1 %v103_v25 }
  0xe4   :  { %581 = vmatprep.mubr.msk.bf16.mxu1 %vm639_vm0, %v638_v1  ;;  %566 = vmatpush3.bf16.msra.mxu1 %v606_v28 }
  0xe5   :  { %567 = vmatprep.subr.bf16.mxu1 %v638_v1 }
  0xe8   :  { %568 = vmatpush3.bf16.msra.mxu1 %v607_v29 }
  0xe9   :  { %569 = vmatprep.subr.bf16.mxu1 %v638_v1 }
  0xec   :  { %570 = vmatpush3.bf16.msra.mxu1 %v608_v30 }
  0xed   :  { %571 = vmatprep.subr.bf16.mxu1 %v638_v1 }
  0xf0   :  { %572 = vmatpush3.bf16.msra.mxu1 %v609_v31 }
  0xf1   :  { %573 = vmatprep.subr.bf16.mxu1 %v638_v1 }
  0xf4   :  { %574 = vmatpush3.bf16.msra.mxu1 %v610_v32 }
  0xf5   :  { %575 = vmatprep.subr.bf16.mxu1 %v638_v1 }
  0xf8   :  { %576 = vmatpush3.bf16.msra.mxu1 %v611_v33 }
  0xf9   :  { %577 = vmatprep.subr.bf16.mxu1 %v638_v1 }
  0xfc   :  { %578 = vmatpush3.bf16.msra.mxu1 %v612_v42 }
  0xfd   :  { %579 = vmatprep.subr.bf16.mxu1 %v638_v1 }
 0x100   :  { %580 = vmatpush3.bf16.msra.mxu1 %v613_v43 }
 0x1b6   :  { %v209_v35 = vpop.f32.mrb[0].mxu1 }
 0x1b7   :  { %v210_v36 = vadd.f32 %v460_v34, %v209_v35  ;;  %v543_v37 = vpop.f32.mrb[1].mxu1 }
 0x1b8   :  { %v212_v38 = vpop.f32.mrb[2].mxu1 }
 0x1b9   :  { %v215_v39 = vmax.f32 %v210_v36, 0.0  ;;  %v544_v40 = vpop.f32.mrb[3].mxu1 }
 0x1bb   :  { %v216_v41 = vpack.c.bf16 %v215_v39, %v215_v39 }
 0x1bd   :  { %562 = vmatmul.mubr.bf16.vlgmr.msra.gmra.mrb[4].mxu0 %v216_v41 }
 0x290   :  { %v322_v45 = vpop.f32.mrb[4].mxu0 }
 0x291   :  { %v323_v46 = vadd.f32 %v469_v44, %v322_v45  ;;  %v563_v47 = vpop.f32.mrb[5].mxu0 }
 0x292   :  { %v325_v48 = vpop.f32.mrb[6].mxu0 }
 0x293   :  { %v328_v49 = vmax.f32 %v323_v46, 0.0  ;;  %v564_v50 = vpop.f32.mrb[7].mxu0 }
 0x295   :  { %v329_v51 = vpack.c.bf16 %v328_v49, %v328_v49 }
 0x297   :  { %582 = vmatmul.mubr.bf16.vlgmr.msra.gmra.mrb[4].mxu1 %v329_v51 }
 0x36a   :  { %v435_v53 = vpop.f32.mrb[4].mxu1 }
 0x36b   :  { %v436_v54 = vadd.f32 %v478_v52, %v435_v53  ;;  %v583_v55 = vpop.f32.mrb[5].mxu1 }
 0x36c   :  { %v438_v56 = vpop.f32.mrb[6].mxu1 }
 0x36d   :  { %441 = vst [vmem:[#allocation2] sm:$0xff] %v436_v54  ;;  %v584_v57 = vpop.f32.mrb[7].mxu1 }
 0x36e   :  { %625 = shalt.err (!%p622_p4)
}
 0x36f   :  { %s626_s8 = scalar_lea.hbm %s839_s9, 128 }
 0x370   :  { %p627_p5 = scmp.ne.s32.totalorder %s839_s9, %s626_s8  ;;  %p630_p6 = scmp.lt.u32.totalorder %s626_s8, %s839_s9 }
 0x372   :  { %p632_p7 = pnand %p630_p6, %p627_p5 }
 0x374   :  { %635 = shalt.err (!%p632_p7)
}
 0x375   :  { %451 = dma.vmem_to_hbm [thread:$0]  %s449_s20, 128, %s839_s9, [#allocation3]  }
 0x376   :  { %636 = dma.done.wait [#allocation3], 128  }
 0x377   :  { %637 = vsyncadd [#allocation3], 4294967168 }
 0x378   :  { %455 = vsyncpa [#allocation3], 1 }

</bundles_post_ra>
